<compile_context>
chip_gen: v7x
topology: tpu7x:2x2x1
jax: 0.10.0
libtpu: 0.0.40
codegen_flags: <defaults>
</compile_context>

<pallas_src>
import functools

import jax
import jax.numpy as jnp
from jax.experimental import pallas as pl
from jax.experimental.pallas import tpu as pltpu


# ---------------------------------------------------------------------------
# Hash-based deterministic Bernoulli bits (identical in-kernel and in jnp).
# ---------------------------------------------------------------------------

_GOLDEN = 0x9E3779B9
_MIX1 = 0x7FEB352D
_MIX2 = 0x846CA68B


def _mix_u32(h):
    """One avalanche round: 2 full-width int multiplies (was 3)."""
    h = h ^ (h >> jnp.uint32(16))
    h = h * jnp.uint32(_MIX1)
    h = h ^ (h >> jnp.uint32(15))
    h = h * jnp.uint32(_MIX2)
    return h


def _drop_threshold_i31(dropout: float) -> int:
    # Drop iff top-31 hash bits < dropout * 2^31.
    return min(int(float(dropout) * float(1 << 31)), (1 << 31) - 1)


def dropout_mask(shape, seed: int, dropout: float):
    """Pure-jnp materialization of the mask the kernel regenerates.

    Reference / export only — MUST stay in lockstep with _sample_drop_kernel.
    """
    m, n = shape
    row = jnp.arange(m, dtype=jnp.uint32)[:, None]
    col = jnp.arange(n, dtype=jnp.uint32)[None, :]
    idx = row * jnp.uint32(n) + col
    h = _mix_u32(idx + jnp.uint32(seed) * jnp.uint32(_GOLDEN))
    r = (h >> jnp.uint32(1)).astype(jnp.int32)          # uniform in [0, 2^31)
    keep = r >= jnp.int32(_drop_threshold_i31(dropout))
    scale = jnp.float32(1.0 / (1.0 - float(dropout)))
    return jnp.where(keep, scale, jnp.float32(0.0))


# ---------------------------------------------------------------------------
# Fused forward kernel: out = x * regenerated_mask(seed)
# ---------------------------------------------------------------------------

def _sample_drop_kernel(seed_ref, x_ref, o_ref, *, dropout, n_cols):
    bm, bn = x_ref.shape
    row0 = pl.program_id(0) * bm
    col0 = pl.program_id(1) * bn

    # Row term on a (bm, 1) column vector: the flat-index multiply touches
    # ~bm/8 vregs instead of the whole tile (VALU saver on v6e/v7x).
    row = jax.lax.broadcasted_iota(jnp.int32, (bm, 1), 0) + row0
    seed_mix = seed_ref[0].astype(jnp.uint32) * jnp.uint32(_GOLDEN)  # scalar-unit
    row_base = row.astype(jnp.uint32) * jnp.uint32(n_cols) + seed_mix  # (bm, 1)

    col = jax.lax.broadcasted_iota(jnp.int32, (bm, bn), 1) + col0
    # Global flat index -> tiling-invariant, per-tile-distinct random bits.
    h = _mix_u32(row_base + col.astype(jnp.uint32))

    r = (h >> jnp.uint32(1)).astype(jnp.int32)           # uniform in [0, 2^31)
    keep = r >= jnp.int32(_drop_threshold_i31(dropout))

    # Native-dtype compute: no f32 upcast (bf16 stays packed -> fewer VPU ops
    # on v6e/v7x; on HBM-bound v5e this is hidden under memory time anyway).
    xv = x_ref[...]
    scale = jnp.asarray(1.0 / (1.0 - dropout), dtype=xv.dtype)
    o_ref[...] = jnp.where(keep, xv * scale, jnp.zeros_like(xv)).astype(o_ref.dtype)


def _sublane(dtype) -> int:
    # Sublane granularity of the (8,128) tiling rule for this dtype.
    return max(8, 32 // jnp.dtype(dtype).itemsize)


def _round_up(a: int, b: int) -> int:
    return ((a + b - 1) // b) * b


@functools.partial(jax.jit, static_argnames=("dropout", "block_rows", "block_cols"))
def sample_drop_forward(x, seed, *, dropout, block_rows: int = 512,
                        block_cols: int = 2048):
    """Applies seed-deterministic sample dropout to a 2-D float array."""
    assert x.ndim == 2
    assert 0.0 < dropout < 1.0
    assert jnp.issubdtype(x.dtype, jnp.floating)
    m, n = x.shape
    # The hash linearizes (row, col) into a uint32; larger arrays would wrap
    # and correlate rows.
    assert m * n < 2**32, "array too large for uint32 flat indexing"

    sub = _sublane(x.dtype)
    bm = m if m <= block_rows else block_rows
    bn = n if n <= block_cols else block_cols
    # (sublane, 128) divisibility only applies when the block is smaller than
    # the full dim — fail loudly on bad caller overrides.
    if bm < m:
        assert bm % sub == 0, f"block_rows must be a multiple of {sub} for {x.dtype}"
    if bn < n:
        assert bn % 128 == 0, "block_cols must be a multiple of 128"

    # v7x: guarantee >= 2 tiles along a 'parallel' axis so both TensorCores
    # get work.  Prefer splitting rows (keeps the last dim lane-dense).
    if pl.cdiv(m, bm) * pl.cdiv(n, bn) == 1:
        if m >= 2 * sub:
            bm = _round_up((m + 1) // 2, sub)
        elif n >= 2 * 128:
            bn = _round_up((n + 1) // 2, 128)

    grid = (pl.cdiv(m, bm), pl.cdiv(n, bn))
    itemsize = jnp.dtype(x.dtype).itemsize
    seed_arr = jnp.asarray(seed, dtype=jnp.int32).reshape((1,))

    kernel = functools.partial(_sample_drop_kernel,
                               dropout=float(dropout), n_cols=n)

    return pl.pallas_call(
        kernel,
        out_shape=jax.ShapeDtypeStruct((m, n), x.dtype),
        grid_spec=pltpu.PrefetchScalarGridSpec(
            num_scalar_prefetch=1,                 # seed lands in SMEM
            grid=grid,
            in_specs=[pl.BlockSpec((bm, bn), lambda i, j, seed_ref: (i, j))],
            out_specs=pl.BlockSpec((bm, bn), lambda i, j, seed_ref: (i, j)),
        ),
        compiler_params=pltpu.CompilerParams(
            # Both axes independent -> megacore sharding on v7x (no-op on
            # single-TC v5e/v6e).  32 MiB also overrides v5e's 16 MiB scoped
            # default and stays inside v7x's 64 MiB physical VMEM.
            dimension_semantics=("parallel", "parallel"),
            vmem_limit_bytes=32 * 1024 * 1024,
        ),
        cost_estimate=pl.CostEstimate(
            flops=16 * m * n,
            transcendentals=0,
            bytes_accessed=2 * m * n * itemsize,
        ),
    )(seed_arr, x)


# ---------------------------------------------------------------------------
# Module wrapper (matches the PyTorch SampleDrop forward semantics).
# ---------------------------------------------------------------------------

class SampleDrop:
    """JAX/Pallas port of the PyTorch SampleDrop module.

    set_weights fixes a new dropout mask (represented by its seed); forward
    applies that same fixed mask until set_weights is called again.
    """

    def __init__(self, dropout: float = 0.0):
        assert 0 <= dropout < 1
        self._dropout = float(dropout)
        self._seed = 0
        self._shape = None
        self.training = True

    def set_weights(self, X, seed: int = 0):
        """Fixes a new dropout mask for inputs shaped like X."""
        assert X.ndim == 2
        assert 0 <= int(seed) < 2**31
        self._seed = int(seed)
        self._shape = tuple(X.shape)

    @property
    def mask(self):
        """Materialized view of the fixed mask (for inspection/export only)."""
        assert self._shape is not None
        if not self.training or not self._dropout:
            return jnp.ones(self._shape, dtype=jnp.float32)
        return dropout_mask(self._shape, self._seed, self._dropout)

    def __call__(self, X):
        """Applies the fixed dropout mask to X."""
        if not self.training or not self._dropout:
            return X
        assert self._shape == tuple(X.shape), "call set_weights first"
        return sample_drop_forward(X, self._seed, dropout=self._dropout)


if __name__ == "__main__":
    key = jax.random.PRNGKey(0)

    # Small demo aligned with the (8, 128) vreg tile.
    batch, hidden = 8, 128
    x = jax.random.normal(key, (batch, hidden), dtype=jnp.float32)

    mod = SampleDrop(dropout=0.5)
    mod.training = True
    mod.set_weights(x, seed=0)

    y = jax.block_until_ready(mod(x))
    expected = x * mod.mask
    assert y.shape == x.shape and y.dtype == x.dtype
    assert jnp.allclose(y, expected, atol=1e-6), "kernel output mismatch"

    # Drop rate sanity: roughly half the elements should be zeroed.
    frac_dropped = float(jnp.mean(mod.mask == 0.0))
    assert 0.3 < frac_dropped < 0.7, f"bad drop fraction {frac_dropped}"

    # Multi-tile grid with partial (masked) edge blocks + custom block sizes.
    x2 = jax.random.normal(jax.random.PRNGKey(1), (70, 300), dtype=jnp.float32)
    y2 = jax.block_until_ready(
        sample_drop_forward(x2, 1234, dropout=0.25,
                            block_rows=32, block_cols=128))
    exp2 = x2 * dropout_mask(x2.shape, 1234, 0.25)
    assert jnp.allclose(y2, exp2, atol=1e-6), "tiled kernel mismatch"

    # bf16 native-compute path + automatic grid split (v7x 2-TC guarantee;
    # harmless on single-TC v5e/v6e).
    x3 = jax.random.normal(jax.random.PRNGKey(2), (64, 256)).astype(jnp.bfloat16)
    y3 = jax.block_until_ready(sample_drop_forward(x3, 7, dropout=0.5))
    exp3 = x3 * dropout_mask(x3.shape, 7, 0.5).astype(jnp.bfloat16)
    assert y3.dtype == jnp.bfloat16
    assert jnp.allclose(y3.astype(jnp.float32), exp3.astype(jnp.float32)), \
        "bf16 kernel mismatch"

    # Eval mode / zero dropout returns X unchanged.
    mod.training = False
    y_eval = jax.block_until_ready(mod(x))
    assert jnp.array_equal(y_eval, x)

    print("KERNEL_OK")
</pallas_src>

<mosaic_0001>
module attributes {stable_mosaic.version = 11 : i64} {
  func.func @_sample_drop_kernel(%arg0: i32, %arg1: i32, %arg2: memref<1xi32, #tpu.memory_space<smem>>, %arg3: memref<8x128xf32, #tpu.memory_space<vmem>>, %arg4: memref<8x128xf32, #tpu.memory_space<vmem>>) attributes {dimension_semantics = [#tpu.dimension_semantics<parallel>, #tpu.dimension_semantics<parallel>], iteration_bounds = array<i64: 1, 1>, scalar_prefetch = 1 : i64, scratch_operands = 0 : i64, tpu.core_type = #tpu.core_type<tc>, window_params = [{transform_indices = @transform_0, window_bounds = array<i64: 8, 128>}, {transform_indices = @transform_1, window_bounds = array<i64: 8, 128>}]} {
    %c8_i32 = arith.constant 8 : i32
    %0 = arith.muli %arg0, %c8_i32 : i32
    %c128_i32 = arith.constant 128 : i32
    %1 = arith.muli %arg1, %c128_i32 : i32
    %2 = tpu.iota {dimensions = array<i32: 0>} : vector<8x1xi32>
    %3 = vector.broadcast %0 : i32 to vector<8x1xi32>
    %4 = arith.addi %2, %3 : vector<8x1xi32>
    %c0 = arith.constant 0 : index
    %5 = memref.load %arg2[%c0] : memref<1xi32, #tpu.memory_space<smem>>
    %c-1640531527_i32 = arith.constant -1640531527 : i32
    %6 = arith.muli %5, %c-1640531527_i32 : i32
    %c128_i32_0 = arith.constant 128 : i32
    %7 = vector.broadcast %c128_i32_0 : i32 to vector<8x1xi32>
    %8 = arith.muli %4, %7 : vector<8x1xi32>
    %9 = vector.broadcast %6 : i32 to vector<8x1xi32>
    %10 = arith.addi %8, %9 : vector<8x1xi32>
    %11 = tpu.iota {dimensions = array<i32: 1>} : vector<8x128xi32>
    %12 = vector.broadcast %1 : i32 to vector<8x128xi32>
    %13 = arith.addi %11, %12 : vector<8x128xi32>
    %14 = vector.broadcast %10 : vector<8x1xi32> to vector<8x128xi32>
    %15 = arith.addi %14, %13 : vector<8x128xi32>
    %c16_i32 = arith.constant 16 : i32
    %16 = vector.broadcast %c16_i32 : i32 to vector<8x128xi32>
    %17 = arith.shrui %15, %16 : vector<8x128xi32>
    %18 = arith.xori %15, %17 : vector<8x128xi32>
    %c2146121005_i32 = arith.constant 2146121005 : i32
    %19 = vector.broadcast %c2146121005_i32 : i32 to vector<8x128xi32>
    %20 = arith.muli %18, %19 : vector<8x128xi32>
    %c15_i32 = arith.constant 15 : i32
    %21 = vector.broadcast %c15_i32 : i32 to vector<8x128xi32>
    %22 = arith.shrui %20, %21 : vector<8x128xi32>
    %23 = arith.xori %20, %22 : vector<8x128xi32>
    %c-2073254261_i32 = arith.constant -2073254261 : i32
    %24 = vector.broadcast %c-2073254261_i32 : i32 to vector<8x128xi32>
    %25 = arith.muli %23, %24 : vector<8x128xi32>
    %c1_i32 = arith.constant 1 : i32
    %26 = vector.broadcast %c1_i32 : i32 to vector<8x128xi32>
    %27 = arith.shrui %25, %26 : vector<8x128xi32>
    %c1073741824_i32 = arith.constant 1073741824 : i32
    %28 = vector.broadcast %c1073741824_i32 : i32 to vector<8x128xi32>
    %29 = arith.cmpi sge, %27, %28 : vector<8x128xi32>
    %c0_1 = arith.constant 0 : index
    %c0_2 = arith.constant 0 : index
    %30 = vector.load %arg3[%c0_1, %c0_2] : memref<8x128xf32, #tpu.memory_space<vmem>>, vector<8x128xf32>
    %cst = arith.constant 2.000000e+00 : f32
    %31 = vector.broadcast %cst : f32 to vector<8x128xf32>
    %32 = arith.mulf %30, %31 : vector<8x128xf32>
    %cst_3 = arith.constant 0.000000e+00 : f32
    %33 = vector.broadcast %cst_3 : f32 to vector<8x128xf32>
    %34 = arith.select %29, %32, %33 : vector<8x128xi1>, vector<8x128xf32>
    %c0_4 = arith.constant 0 : index
    %c0_5 = arith.constant 0 : index
    %35 = vector.load %arg4[%c0_4, %c0_5] : memref<8x128xf32, #tpu.memory_space<vmem>>, vector<8x128xf32>
    tpu.vector_store %arg4[%c0_4, %c0_5], %34 {strides = array<i32>} : memref<8x128xf32, #tpu.memory_space<vmem>>, vector<8x128xf32>,
    return
  }
  func.func @transform_0(%arg0: i32, %arg1: i32, %arg2: memref<1xi32, #tpu.memory_space<smem>>) -> (i32, i32) {
    %c0_i32 = arith.constant 0 : i32
    return %arg0, %arg1 : i32, i32
  }
  func.func @transform_1(%arg0: i32, %arg1: i32, %arg2: memref<1xi32, #tpu.memory_space<smem>>) -> (i32, i32) {
    %c0_i32 = arith.constant 0 : i32
    return %arg0, %arg1 : i32, i32
  }
}

</mosaic_0001>

<bundles_post_ra>
// kernel: sample_drop_forward.1
= control target key start
LH: loop header
LB: loop body
LE: loop exit
PB: predicated region body
PF: predicated region fallthrough
CT: control target
= control target key end

     0   :  { %8 = vsyncpa [#allocation5], 0  ;;  %s160_s0 = inlined_call_operand.<no memory space> [shape: s32[1], index: 0, kind: input, shape index: {}]   ;;  %s161_s1 = inlined_call_operand.hbm [shape: f32[8,128], index: 1, kind: input, shape index: {}]   ;;  %s162_s2 = inlined_call_operand.hbm [shape: f32[8,128], index: 2, kind: output, shape index: {}]  }
   0x1   :  { %9 = vsyncpa [#allocation6], 0  ;;  %s116_s9 = smov [#allocation4]   ;;  %s68_s13 = scalar_lea.hbm %s161_s1, 128 }
   0x2   :  { %s16_s10 = sshll.u32 %s116_s9, 4  ;;  %p69_p0 = scmp.ne.s32.totalorder %s161_s1, %s68_s13  ;;  %s17_s10 = int_to_ptr.vmem [resolvable:$true] %s16_s10 }
   0x3   :  { %p72_p1 = scmp.lt.u32.totalorder %s68_s13, %s161_s1 }
   0x5   :  { %p74_p2 = pnand %p72_p1, %p69_p0 }
   0x7   :  { %77 = shalt.err (!%p74_p2)
}
   0x8   :  { %s78_s18 = scalar_lea.vmem %s17_s10, 128  ;;  %p83_p4 = scmp.lt.s32.totalorder %s17_s10, %s17_s10 }
   0x9   :  { %p79_p3 = scmp.ne.s32.totalorder %s17_s10, %s78_s18  ;;  %p84_p5 = scmp.lt.s32.totalorder %s78_s18, %s78_s18 }
   0xb   :  { %p85_p6 = por %p84_p5, %p83_p4 }
   0xd   :  { %p86_p7 = pnand %p85_p6, %p79_p3 }
   0xf   :  { %89 = shalt.err (!%p86_p7)
}
  0x10   :  { %19 = dma.hbm_to_vmem [thread:$0]  %s161_s1, 128, %s17_s10, [#allocation5]  }
  0x11   :  { %112 = dma.done.wait [#allocation5], 128  }
  0x12   :  { %113 = vsyncadd [#allocation5], 4294967168  ;;  %v25_v0 = vlaneseq  ;;  %s30_s23 = smul.u32 2654435769, %s160_s0  ;;  %v47_v12 = vld [vmem:[#allocation4] sm:$0xff]  ;;  %s117_s1 = smov [#allocation7]  }
  0x13   :  { %v48_v14 = vmul.f32 2.0, %v47_v12  ;;  %s57_s24 = sshll.u32 %s117_s1, 4  ;;  %s58_s24 = int_to_ptr.vmem [resolvable:$true] %s57_s24 }
  0x14   :  { %v26_v1 = vshrl.u32 %v25_v0, 7  ;;  %v32_v2 = vstv %s30_s23  ;;  %v35_v4 = vand.u32 127, %v25_v0  ;;  %s90_s0 = scalar_lea.vmem %s58_s24, 128  ;;  %p95_p9 = scmp.lt.s32.totalorder %s58_s24, %s58_s24 }
  0x15   :  { %p91_p8 = scmp.ne.s32.totalorder %s58_s24, %s90_s0  ;;  %p96_p10 = scmp.lt.s32.totalorder %s90_s0, %s90_s0 }
  0x16   :  { %v31_v3 = vmul.u32 128, %v26_v1 }
  0x17   :  { %p97_p11 = por %p96_p10, %p95_p9 }
  0x18   :  { %v33_v5 = vadd.s32 %v32_v2, %v31_v3 }
  0x19   :  { %p98_p12 = pnand %p97_p11, %p91_p8 }
  0x1a   :  { %v38_v6 = vadd.s32 %v35_v4, %v33_v5 }
  0x1c   :  { %v39_v7 = vshrl.u32 %v38_v6, 16 }
  0x1e   :  { %v40_v8 = vxor.u32 %v39_v7, %v38_v6 }
  0x20   :  { %v41_v9 = vmul.u32 2146121005, %v40_v8 }
  0x22   :  { %v42_v10 = vshrl.u32 %v41_v9, 15 }
  0x24   :  { %v43_v11 = vxor.u32 %v42_v10, %v41_v9 }
  0x26   :  { %v44_v13 = vmul.u32 2221713035, %v43_v11 }
  0x28   :  { %v45_v15 = vshrl.u32 %v44_v13, 1 }
  0x2a   :  { %vm46_vm0 = vcmp.ge.s32.totalorder %v45_v15, 1073741824 }
  0x2b   :  { %v49_v16 = vsel %vm46_vm0, %v48_v14, 0.0 }
  0x2c   :  { %50 = vst [vmem:[#allocation7] sm:$0xff] %v49_v16 }
  0x2d   :  { %101 = shalt.err (!%p98_p12)
}
  0x2e   :  { %s102_s27 = scalar_lea.hbm %s162_s2, 128 }
  0x2f   :  { %p103_p13 = scmp.ne.s32.totalorder %s162_s2, %s102_s27  ;;  %p106_p0 = scmp.lt.u32.totalorder %s102_s27, %s162_s2 }
  0x31   :  { %p108_p1 = pnand %p106_p0, %p103_p13 }
  0x33   :  { %111 = shalt.err (!%p108_p1)
}
  0x34   :  { %60 = dma.vmem_to_hbm [thread:$0]  %s58_s24, 128, %s162_s2, [#allocation6]  }
  0x35   :  { %114 = dma.done.wait [#allocation6], 128  }
  0x36   :  { %115 = vsyncadd [#allocation6], 4294967168 }
  0x37   :  { %64 = vsyncpa [#allocation5], 1 }
  0x38   :  { %65 = vsyncpa [#allocation6], 1 }

</bundles_post_ra>
